<compile_context>
chip_gen: v5e
topology: v5e:2x2
jax: 0.10.0
libtpu: 0.0.40
codegen_flags: <defaults>
</compile_context>

<pallas_src>
import jax
import jax.numpy as jnp
from jax.experimental import pallas as pl
from jax.experimental.pallas import tpu as pltpu

_R_MAX = 1024  # rows (of 128 points each) per grid step -> up to 128K pts/step


def _box_sdf_kernel(center_ref, half_ref, pts_ref, out_ref):
    # center_ref, half_ref : (3,) f32 in SMEM (scalars)
    # pts_ref              : (3, R, 128) f32 in VMEM  (SoA coordinate planes)
    # out_ref              : (R, 128) f32 in VMEM
    d0 = jnp.abs(pts_ref[0] - center_ref[0]) - half_ref[0]   # (R, 128)
    d1 = jnp.abs(pts_ref[1] - center_ref[1]) - half_ref[1]
    d2 = jnp.abs(pts_ref[2] - center_ref[2]) - half_ref[2]

    c0 = jnp.maximum(d0, 0.0)
    c1 = jnp.maximum(d1, 0.0)
    c2 = jnp.maximum(d2, 0.0)
    norm = jnp.sqrt(c0 * c0 + c1 * c1 + c2 * c2)              # VPU only

    max_d = jnp.maximum(jnp.maximum(d0, d1), d2)
    out_ref[...] = norm + jnp.minimum(max_d, 0.0)


@jax.jit
def box_sdf(sample_points, center, side_lengths):
    """sample_points: (..., 3) f32; center: (1, 3); side_lengths: (1, 3).

    Returns signed distance of shape (N, 1), N = prod(sample_points.shape[:-1]),
    matching the PyTorch module's output exactly.
    """
    pts = sample_points.reshape(-1, 3).astype(jnp.float32)           # (N, 3)
    n = pts.shape[0]

    nb = pl.cdiv(n, 128)                 # rows of 128 points
    r = min(_R_MAX, nb)                  # rows per grid step
    nb_pad = pl.cdiv(nb, r) * r
    n_pad = nb_pad * 128

    # Single AoS -> SoA relayout; the tail pad fuses into the same XLA copy.
    pts_soa = pts.T                                                  # (3, N)
    if n_pad != n:
        pts_soa = jnp.pad(pts_soa, ((0, 0), (0, n_pad - n)))
    pts_soa = pts_soa.reshape(3, nb_pad, 128)                        # free reshape

    center_vec = center.reshape(3).astype(jnp.float32)               # (3,)
    half_vec = side_lengths.reshape(3).astype(jnp.float32) / 2.0     # (3,)

    out = pl.pallas_call(
        _box_sdf_kernel,
        out_shape=jax.ShapeDtypeStruct((nb_pad, 128), jnp.float32),
        grid=(nb_pad // r,),
        in_specs=[
            pl.BlockSpec(memory_space=pltpu.MemorySpace.SMEM),        # center
            pl.BlockSpec(memory_space=pltpu.MemorySpace.SMEM),        # half sides
            pl.BlockSpec((3, r, 128), lambda i: (0, i, 0)),           # point planes
        ],
        out_specs=pl.BlockSpec((r, 128), lambda i: (i, 0)),
        compiler_params=pltpu.CompilerParams(
            dimension_semantics=("parallel",)),                       # megacore / v7x
    )(center_vec, half_vec, pts_soa)

    sdf = out.reshape(-1)[:n]                                         # (N,)
    return sdf[:, None]                                               # (N, 1)


def _box_sdf_reference(sample_points, center, side_lengths):
    p = sample_points.reshape(-1, 3).astype(jnp.float32)
    diff = jnp.abs(p - center) - side_lengths / 2.0
    sdf = (jnp.linalg.norm(jnp.maximum(diff, 0.0), axis=-1)
           + jnp.minimum(jnp.max(diff, axis=-1), 0.0))
    return sdf[:, None]


if __name__ == "__main__":
    key = jax.random.PRNGKey(0)

    # Deterministic "parameters" (cfg.center.val / cfg.side_lengths.val), shape (1, 3).
    center = jnp.array([[0.1, -0.2, 0.3]], dtype=jnp.float32)
    side_lengths = jnp.array([[1.0, 1.5, 2.0]], dtype=jnp.float32)

    # ray_bundle.sample_points: (num_rays, samples_per_ray, 3) -> flattened (N, 3).
    sample_points = jax.random.uniform(
        key, (16, 12, 3), dtype=jnp.float32, minval=-2.0, maxval=2.0)

    out = box_sdf(sample_points, center, side_lengths)
    out = jax.block_until_ready(out)

    ref = _box_sdf_reference(sample_points, center, side_lengths)
    assert out.shape == (16 * 12, 1), out.shape
    assert jnp.allclose(out, ref, atol=1e-5, rtol=1e-5), (
        float(jnp.max(jnp.abs(out - ref))))

    print("KERNEL_OK")
</pallas_src>

<mosaic_0001>
module attributes {stable_mosaic.version = 11 : i64} {
  func.func @_box_sdf_kernel(%arg0: i32, %arg1: memref<3xf32, #tpu.memory_space<smem>>, %arg2: memref<3xf32, #tpu.memory_space<smem>>, %arg3: memref<3x2x128xf32, #tpu.memory_space<vmem>>, %arg4: memref<2x128xf32, #tpu.memory_space<vmem>>) attributes {dimension_semantics = [#tpu.dimension_semantics<parallel>], iteration_bounds = array<i64: 1>, scalar_prefetch = 0 : i64, scratch_operands = 0 : i64, tpu.core_type = #tpu.core_type<tc>, window_params = [{transform_indices = @transform_0, window_bounds = array<i64: 3>}, {transform_indices = @transform_1, window_bounds = array<i64: 3>}, {transform_indices = @transform_2, window_bounds = array<i64: 3, 2, 128>}, {transform_indices = @transform_3, window_bounds = array<i64: 2, 128>}]} {
    %c0 = arith.constant 0 : index
    %c0_0 = arith.constant 0 : index
    %c0_1 = arith.constant 0 : index
    %0 = vector.load %arg3[%c0, %c0_0, %c0_1] : memref<3x2x128xf32, #tpu.memory_space<vmem>>, vector<1x2x128xf32>
    %1 = vector.shape_cast %0 : vector<1x2x128xf32> to vector<2x128xf32>
    %c0_2 = arith.constant 0 : index
    %2 = memref.load %arg1[%c0_2] : memref<3xf32, #tpu.memory_space<smem>>
    %3 = vector.broadcast %2 : f32 to vector<2x128xf32>
    %4 = arith.subf %1, %3 : vector<2x128xf32>
    %5 = math.absf %4 : vector<2x128xf32>
    %c0_3 = arith.constant 0 : index
    %6 = memref.load %arg2[%c0_3] : memref<3xf32, #tpu.memory_space<smem>>
    %7 = vector.broadcast %6 : f32 to vector<2x128xf32>
    %8 = arith.subf %5, %7 : vector<2x128xf32>
    %c1 = arith.constant 1 : index
    %c0_4 = arith.constant 0 : index
    %c0_5 = arith.constant 0 : index
    %9 = vector.load %arg3[%c1, %c0_4, %c0_5] : memref<3x2x128xf32, #tpu.memory_space<vmem>>, vector<1x2x128xf32>
    %10 = vector.shape_cast %9 : vector<1x2x128xf32> to vector<2x128xf32>
    %c1_6 = arith.constant 1 : index
    %11 = memref.load %arg1[%c1_6] : memref<3xf32, #tpu.memory_space<smem>>
    %12 = vector.broadcast %11 : f32 to vector<2x128xf32>
    %13 = arith.subf %10, %12 : vector<2x128xf32>
    %14 = math.absf %13 : vector<2x128xf32>
    %c1_7 = arith.constant 1 : index
    %15 = memref.load %arg2[%c1_7] : memref<3xf32, #tpu.memory_space<smem>>
    %16 = vector.broadcast %15 : f32 to vector<2x128xf32>
    %17 = arith.subf %14, %16 : vector<2x128xf32>
    %c2 = arith.constant 2 : index
    %c0_8 = arith.constant 0 : index
    %c0_9 = arith.constant 0 : index
    %18 = vector.load %arg3[%c2, %c0_8, %c0_9] : memref<3x2x128xf32, #tpu.memory_space<vmem>>, vector<1x2x128xf32>
    %19 = vector.shape_cast %18 : vector<1x2x128xf32> to vector<2x128xf32>
    %c2_10 = arith.constant 2 : index
    %20 = memref.load %arg1[%c2_10] : memref<3xf32, #tpu.memory_space<smem>>
    %21 = vector.broadcast %20 : f32 to vector<2x128xf32>
    %22 = arith.subf %19, %21 : vector<2x128xf32>
    %23 = math.absf %22 : vector<2x128xf32>
    %c2_11 = arith.constant 2 : index
    %24 = memref.load %arg2[%c2_11] : memref<3xf32, #tpu.memory_space<smem>>
    %25 = vector.broadcast %24 : f32 to vector<2x128xf32>
    %26 = arith.subf %23, %25 : vector<2x128xf32>
    %cst = arith.constant 0.000000e+00 : f32
    %27 = vector.broadcast %cst : f32 to vector<2x128xf32>
    %28 = arith.maximumf %8, %27 : vector<2x128xf32>
    %cst_12 = arith.constant 0.000000e+00 : f32
    %29 = vector.broadcast %cst_12 : f32 to vector<2x128xf32>
    %30 = arith.maximumf %17, %29 : vector<2x128xf32>
    %cst_13 = arith.constant 0.000000e+00 : f32
    %31 = vector.broadcast %cst_13 : f32 to vector<2x128xf32>
    %32 = arith.maximumf %26, %31 : vector<2x128xf32>
    %33 = arith.mulf %28, %28 : vector<2x128xf32>
    %34 = arith.mulf %30, %30 : vector<2x128xf32>
    %35 = arith.addf %33, %34 : vector<2x128xf32>
    %36 = arith.mulf %32, %32 : vector<2x128xf32>
    %37 = arith.addf %35, %36 : vector<2x128xf32>
    %38 = math.sqrt %37 : vector<2x128xf32>
    %39 = arith.maximumf %8, %17 : vector<2x128xf32>
    %40 = arith.maximumf %39, %26 : vector<2x128xf32>
    %cst_14 = arith.constant 0.000000e+00 : f32
    %41 = vector.broadcast %cst_14 : f32 to vector<2x128xf32>
    %42 = arith.minimumf %40, %41 : vector<2x128xf32>
    %43 = arith.addf %38, %42 : vector<2x128xf32>
    %c0_15 = arith.constant 0 : index
    %c0_16 = arith.constant 0 : index
    %44 = vector.load %arg4[%c0_15, %c0_16] : memref<2x128xf32, #tpu.memory_space<vmem>>, vector<2x128xf32>
    tpu.vector_store %arg4[%c0_15, %c0_16], %43 {strides = array<i32>} : memref<2x128xf32, #tpu.memory_space<vmem>>, vector<2x128xf32>,
    return
  }
  func.func @transform_0(%arg0: i32) -> i32 {
    %c0_i32 = arith.constant 0 : i32
    %c0_i32_0 = arith.constant 0 : i32
    return %c0_i32 : i32
  }
  func.func @transform_1(%arg0: i32) -> i32 {
    %c0_i32 = arith.constant 0 : i32
    %c0_i32_0 = arith.constant 0 : i32
    return %c0_i32 : i32
  }
  func.func @transform_2(%arg0: i32) -> (i32, i32, i32) {
    %c0_i32 = arith.constant 0 : i32
    %c0_i32_0 = arith.constant 0 : i32
    %c0_i32_1 = arith.constant 0 : i32
    return %c0_i32, %arg0, %c0_i32_0 : i32, i32, i32
  }
  func.func @transform_3(%arg0: i32) -> (i32, i32) {
    %c0_i32 = arith.constant 0 : i32
    %c0_i32_0 = arith.constant 0 : i32
    return %arg0, %c0_i32 : i32, i32
  }
}

</mosaic_0001>

<bundles_post_ra>
// kernel: box_sdf.1
= control target key start
LH: loop header
LB: loop body
LE: loop exit
PB: predicated region body
PF: predicated region fallthrough
CT: control target
= control target key end

     0   :  { %8 = vsyncpa [#allocation4], 0  ;;  %s215_s0 = inlined_call_operand.vmem [shape: f32[3], index: 0, kind: input, shape index: {}]   ;;  %s216_s1 = inlined_call_operand.vmem [shape: f32[3], index: 1, kind: input, shape index: {}]   ;;  %s217_s2 = inlined_call_operand.vmem [shape: f32[3,2,128], index: 2, kind: input, shape index: {}]   ;;  %s218_s3 = inlined_call_operand.hbm [shape: f32[2,128], index: 3, kind: output, shape index: {}]  }
   0x1   :  { %9 = vsyncpa [#allocation6], 0 }
   0x2   :  { %10 = vsyncpa [#allocation3], 0  ;;  %s16_s14 = sshll.u32 %s215_s0, 4  ;;  %s25_s17 = sshll.u32 %s216_s1, 4  ;;  %s17_s14 = int_to_ptr.vmem [resolvable:$true] %s16_s14  ;;  %s26_s17 = int_to_ptr.vmem [resolvable:$true] %s25_s17 }
   0x3   :  { %s174_s18 = smov [#allocation2]   ;;  %s175_s19 = smov [#allocation5]  }
   0x4   :  { %19 = dma.vmem_to_smem %s17_s14, 16, %s174_s18, [#allocation4]  }
   0x5   :  { %28 = dma.vmem_to_smem %s26_s17, 16, %s175_s19, [#allocation6]  }
   0x6   :  { %168 = dma.done.wait [#allocation4], 16  }
   0x7   :  { %169 = vsyncadd [#allocation4], 4294967280 }
   0x8   :  { %170 = dma.done.wait [#allocation6], 16  }
   0x9   :  { %171 = vsyncadd [#allocation6], 4294967280 }
   0xa   :  { %39 = sfence }
   0xb   :  { %s41_s20 = sld [smem:[#allocation2]]  ;;  %v40_v0 = vld [vmem:[%s217_s2] sm:$0x3]  ;;  %v109_v2 = vld [vmem:[%s217_s2 + $0x2] sm:$0x3]  ;;  %s98_s6 = sshll.u32 %s218_s3, 4  ;;  %s99_s6 = int_to_ptr.hbm [resolvable:$true] %s98_s6 }
   0xc   :  { %s45_s21 = sld [smem:[#allocation5]]  ;;  %v112_v6 = vld [vmem:[%s217_s2 + $0x4] sm:$0x3]  ;;  %s176_s2 = smov [#allocation7]  }
   0xd   :  { %s110_s22 = sld [smem:[#allocation2 + $0x1]]  ;;  %s96_s30 = sshll.u32 %s176_s2, 4  ;;  %s97_s30 = int_to_ptr.vmem [resolvable:$true] %s96_s30 }
   0xe   :  { %s111_s23 = sld [smem:[#allocation5 + $0x1]] }
   0xf   :  { %s113_s25 = sld [smem:[#allocation2 + $0x2]] }
  0x10   :  { %s114_s1 = sld [smem:[#allocation5 + $0x2]] }
  0x11   :  { %v42_v1 = vstv %s41_s20 }
  0x12   :  { %v43_v3 = vsub.f32 %v40_v0, %v42_v1  ;;  %v46_v4 = vstv %s45_s21 }
  0x13   :  { %v51_v5 = vstv %s110_s22 }
  0x14   :  { %v44_v7 = vand.u32 2147483647, %v43_v3  ;;  %v52_v8 = vsub.f32 %v109_v2, %v51_v5  ;;  %v55_v9 = vstv %s111_s23 }
  0x15   :  { %v60_v10 = vstv %s113_s25 }
  0x16   :  { %v47_v11 = vsub.f32 %v44_v7, %v46_v4  ;;  %v53_v12 = vand.u32 2147483647, %v52_v8  ;;  %v61_v13 = vsub.f32 %v112_v6, %v60_v10  ;;  %v64_v14 = vstv %s114_s1 }
  0x18   :  { %v56_v15 = vsub.f32 %v53_v12, %v55_v9  ;;  %v62_v16 = vand.u32 2147483647, %v61_v13  ;;  %v66_v17 = vmax.f32 %v47_v11, 0.0 }
  0x1a   :  { %v65_v18 = vsub.f32 %v62_v16, %v64_v14  ;;  %v67_v19 = vmax.f32 %v56_v15, 0.0  ;;  %v69_v20 = vmul.f32 %v66_v17, %v66_v17  ;;  %v86_v29 = vmax.f32 %v47_v11, %v56_v15 }
  0x1c   :  { %v68_v21 = vmax.f32 %v65_v18, 0.0  ;;  %v70_v22 = vmul.f32 %v67_v19, %v67_v19  ;;  %v87_v32 = vmax.f32 %v86_v29, %v65_v18 }
  0x1e   :  { %v71_v23 = vadd.f32 %v70_v22, %v69_v20  ;;  %v72_v24 = vmul.f32 %v68_v21, %v68_v21  ;;  %v88_v36 = vmin.f32 %v87_v32, 0.0 }
  0x20   :  { %v73_v25 = vadd.f32 %v72_v24, %v71_v23 }
  0x22   :  { %118 = vrsqrt.f32 %v73_v25  ;;  %vm81_vm0 = vcmp.eq.f32.partialorder %v73_v25, inf  ;;  %v84_v34 = vand.u32 2147483648, %v73_v25  ;;  %vm83_vm1 = vcmp.eq.f32.partialorder %v73_v25, 0.0 }
  0x28   :  { %v119_v26 = vpop.eup %118 }
  0x29   :  { %v75_v27 = vmul.f32 %v119_v26, %v73_v25 }
  0x2b   :  { %v76_v28 = vmul.f32 %v119_v26, %v75_v27 }
  0x2d   :  { %v77_v30 = vmul.f32 0.5, %v76_v28 }
  0x2f   :  { %v78_v31 = vsub.f32 1.5, %v77_v30 }
  0x31   :  { %v79_v33 = vmul.f32 %v119_v26, %v78_v31 }
  0x33   :  { %v80_v35 = vmul.f32 %v79_v33, %v73_v25 }
  0x35   :  { %v82_v37 = vsel %vm81_vm0, %v73_v25, %v80_v35 }
  0x36   :  { %v85_v38 = vsel %vm83_vm1, %v84_v34, %v82_v37 }
  0x37   :  { %v89_v39 = vadd.f32 %v88_v36, %v85_v38 }
  0x39   :  { %90 = vst [vmem:[#allocation7] sm:$0x3] %v89_v39 }
  0x3a   :  { %101 = dma.vmem_to_hbm [thread:$0]  %s97_s30, 32, %s99_s6, [#allocation3]  }
  0x3b   :  { %172 = dma.done.wait [#allocation3], 32  }
  0x3c   :  { %173 = vsyncadd [#allocation3], 4294967264 }
  0x3d   :  { %106 = vsyncpa [#allocation3], 1 }
  0x3e   :  { %107 = vsyncpa [#allocation4], 1 }
  0x3f   :  { %108 = vsyncpa [#allocation6], 1 }

</bundles_post_ra>
